<compile_context>
chip_gen: v7x
topology: tpu7x:2x2x1
jax: 0.10.0
libtpu: 0.0.40
codegen_flags: <defaults>
</compile_context>

<pallas_src>
import functools

import jax
import jax.numpy as jnp
import numpy as np
from jax.experimental import pallas as pl
from jax.experimental.pallas import tpu as pltpu

_LANES = 128      # vreg lane width (fast axis)
_SUBLANES = 8     # f32 sublanes per vreg (slow axis)


# ----------------------------------------------------------------------------
# Coverage kernel: single fused lane-dense slab, identity pass-through.
# ----------------------------------------------------------------------------
def _identity_slab_kernel(slab_ref, out_ref):
    # Whole-slab VPU identity; (rows, 128) with rows % 8 == 0 => unmasked vst.
    out_ref[...] = slab_ref[...]


def _pack_inputs(images, domains, contents):
    """Fuse the three inputs into one lane-dense (rows, 128) f32 slab."""
    flat = jnp.concatenate([
        images.reshape(-1).astype(jnp.float32),
        domains.reshape(-1).astype(jnp.float32),
        contents.reshape(-1).astype(jnp.float32),
    ])
    n = flat.shape[0]
    tile = _SUBLANES * _LANES
    padded = ((n + tile - 1) // tile) * tile
    flat = jnp.pad(flat, (0, padded - n))
    return flat.reshape(padded // _LANES, _LANES), n


@functools.partial(jax.jit, donate_argnums=(0,))
def _passthrough_slab(slab):
    """Identity copy on TPU; output aliases the (donated) input buffer."""
    return pl.pallas_call(
        _identity_slab_kernel,
        out_shape=jax.ShapeDtypeStruct(slab.shape, slab.dtype),
        in_specs=[pl.BlockSpec(memory_space=pltpu.VMEM)],
        out_specs=pl.BlockSpec(memory_space=pltpu.VMEM),
        input_output_aliases={0: 0},
    )(slab)


# ----------------------------------------------------------------------------
# Module wrapper: mirrors the PyTorch Classifier exactly.
# ----------------------------------------------------------------------------
class Classifier:
    """JAX mirror of models/vdn.py::Classifier (no parameters, returns None)."""

    def __init__(self):
        # Reference __init__ declares no parameters/submodules.
        pass

    def forward(self, images, domains, contents):
        """
        images:   (batch_size, channels, height, width)   -- NCHW
        domains:  (batch_size, num_domains)
        contents: (batch_size, num_contents)

        The reference body is `pass`, i.e. no compute and a None result.
        No kernel is launched here (zero overhead), matching the reference.
        """
        return None

    __call__ = forward


if __name__ == "__main__":
    key = jax.random.PRNGKey(0)
    k_img, k_dom, k_con = jax.random.split(key, 3)

    batch_size = 2
    channels = 4
    height = width = 16
    num_domains = 4
    num_contents = 8

    images = jax.random.normal(
        k_img, (batch_size, channels, height, width), dtype=jnp.float32)
    domains = jax.random.normal(
        k_dom, (batch_size, num_domains), dtype=jnp.float32)
    contents = jax.random.normal(
        k_con, (batch_size, num_contents), dtype=jnp.float32)

    # Module semantics: forward does nothing and returns None.
    model = Classifier()
    result = model(images, domains, contents)
    assert result is None

    # Pallas plumbing coverage (outside forward): fused lane-dense slab copy
    # with aliased output.
    slab, n_valid = _pack_inputs(images, domains, contents)
    expected = np.asarray(slab)          # host copy BEFORE donation
    out = _passthrough_slab(slab)        # `slab` buffer is donated/aliased
    out = jax.block_until_ready(out)

    out_np = np.asarray(out)
    assert out_np.shape == expected.shape
    assert out_np.shape[1] == _LANES and out_np.shape[0] % _SUBLANES == 0
    assert np.allclose(out_np, expected)

    # Round-trip the fused slab back into the original tensors and verify.
    flat = out_np.reshape(-1)[:n_valid]
    n_img = images.size
    n_dom = domains.size
    img_rt = flat[:n_img].reshape(images.shape)
    dom_rt = flat[n_img:n_img + n_dom].reshape(domains.shape)
    con_rt = flat[n_img + n_dom:].reshape(contents.shape)
    assert np.allclose(img_rt, np.asarray(images))
    assert np.allclose(dom_rt, np.asarray(domains))
    assert np.allclose(con_rt, np.asarray(contents))

    print("KERNEL_OK")
</pallas_src>

<mosaic_0001>
module attributes {stable_mosaic.version = 11 : i64} {
  func.func @_identity_slab_kernel(%arg0: memref<24x128xf32, #tpu.memory_space<vmem>>, %arg1: memref<24x128xf32, #tpu.memory_space<vmem>>) attributes {dimension_semantics = [], scalar_prefetch = 0 : i64, scratch_operands = 0 : i64, tpu.core_type = #tpu.core_type<tc>} {
    %c0 = arith.constant 0 : index
    %c0_0 = arith.constant 0 : index
    %0 = vector.load %arg0[%c0, %c0_0] : memref<24x128xf32, #tpu.memory_space<vmem>>, vector<24x128xf32>
    %c0_1 = arith.constant 0 : index
    %c0_2 = arith.constant 0 : index
    %1 = vector.load %arg1[%c0_1, %c0_2] : memref<24x128xf32, #tpu.memory_space<vmem>>, vector<24x128xf32>
    tpu.vector_store %arg1[%c0_1, %c0_2], %0 {strides = array<i32>} : memref<24x128xf32, #tpu.memory_space<vmem>>, vector<24x128xf32>,
    return
  }
}

</mosaic_0001>

<bundles_post_ra>
// kernel: _passthrough_slab.1
= control target key start
LH: loop header
LB: loop body
LE: loop exit
PB: predicated region body
PF: predicated region fallthrough
CT: control target
= control target key end

     0   :  { %6 = vsyncpa [#allocation3], 0  ;;  %s136_s0 = inlined_call_operand.hbm [shape: f32[24,128], index: 0, kind: input, shape index: {}, may-alias: {0,1}]   ;;  %s137_s1 = inlined_call_operand.hbm [shape: f32[24,128], index: 1, kind: output, shape index: {}, may-alias: {0,1}]  }
   0x1   :  { %7 = vsyncpa [#allocation4], 0  ;;  %s98_s6 = smov [#allocation2]   ;;  %s50_s10 = scalar_lea.hbm %s136_s0, 384 }
   0x2   :  { %s13_s7 = sshll.u32 %s98_s6, 4  ;;  %p51_p0 = scmp.ne.s32.totalorder %s136_s0, %s50_s10  ;;  %s14_s7 = int_to_ptr.vmem [resolvable:$true] %s13_s7 }
   0x3   :  { %p54_p1 = scmp.lt.u32.totalorder %s50_s10, %s136_s0 }
   0x5   :  { %p56_p2 = pnand %p54_p1, %p51_p0 }
   0x7   :  { %59 = shalt.err (!%p56_p2)
}
   0x8   :  { %s60_s15 = scalar_lea.vmem %s14_s7, 384  ;;  %p65_p4 = scmp.lt.s32.totalorder %s14_s7, %s14_s7 }
   0x9   :  { %p61_p3 = scmp.ne.s32.totalorder %s14_s7, %s60_s15  ;;  %p66_p5 = scmp.lt.s32.totalorder %s60_s15, %s60_s15 }
   0xb   :  { %p67_p6 = por %p66_p5, %p65_p4 }
   0xd   :  { %p68_p7 = pnand %p67_p6, %p61_p3 }
   0xf   :  { %71 = shalt.err (!%p68_p7)
}
  0x10   :  { %s99_s16 = smov 128   ;;  %s100_s17 = smov 8  }
  0x11   :  { %19 = dma.hbm_to_vmem [thread:$0]  %s136_s0, 384, %s14_s7, [#allocation3], %s99_s16, %s99_s16, %s100_s17  }
  0x12   :  { %94 = dma.done.wait [#allocation3], 384  }
  0x13   :  { %95 = vsyncadd [#allocation3], 4294966912  ;;  %s101_s20 = smov [#allocation5]   ;;  %v23_v0 = vld [vmem:[#allocation2] sm:$0xff]  ;;  %v24_v1 = vld [vmem:[#allocation2 + $0x8] sm:$0xff] }
  0x14   :  { %s34_s21 = sshll.u32 %s101_s20, 4  ;;  %v25_v2 = vld [vmem:[#allocation2 + $0x10] sm:$0xff]  ;;  %26 = vst [vmem:[#allocation5] sm:$0xff] %v23_v0  ;;  %27 = vst [vmem:[#allocation5 + $0x8] sm:$0xff] %v24_v1  ;;  %s35_s21 = int_to_ptr.vmem [resolvable:$true] %s34_s21 }
  0x15   :  { %28 = vst [vmem:[#allocation5 + $0x10] sm:$0xff] %v25_v2  ;;  %s72_s22 = scalar_lea.vmem %s35_s21, 384  ;;  %p77_p9 = scmp.lt.s32.totalorder %s35_s21, %s35_s21 }
  0x16   :  { %p73_p8 = scmp.ne.s32.totalorder %s35_s21, %s72_s22  ;;  %p78_p10 = scmp.lt.s32.totalorder %s72_s22, %s72_s22 }
  0x18   :  { %p79_p11 = por %p78_p10, %p77_p9 }
  0x1a   :  { %p80_p12 = pnand %p79_p11, %p73_p8 }
  0x1c   :  { %83 = shalt.err (!%p80_p12)
}
  0x1d   :  { %s84_s24 = scalar_lea.hbm %s137_s1, 384 }
  0x1e   :  { %p85_p13 = scmp.ne.s32.totalorder %s137_s1, %s84_s24  ;;  %p88_p0 = scmp.lt.u32.totalorder %s84_s24, %s137_s1 }
  0x20   :  { %p90_p1 = pnand %p88_p0, %p85_p13 }
  0x22   :  { %93 = shalt.err (!%p90_p1)
}
  0x23   :  { %40 = dma.vmem_to_hbm [thread:$0]  %s35_s21, 384, %s137_s1, [#allocation4], %s99_s16, %s99_s16, %s100_s17  }
  0x24   :  { %96 = dma.done.wait [#allocation4], 384  }
  0x25   :  { %97 = vsyncadd [#allocation4], 4294966912 }
  0x26   :  { %44 = vsyncpa [#allocation3], 1 }
  0x27   :  { %45 = vsyncpa [#allocation4], 1 }

</bundles_post_ra>
